<compile_context>
chip_gen: v5e
topology: v5e:2x2
jax: 0.10.0
libtpu: 0.0.40
codegen_flags: <defaults>
</compile_context>

<pallas_src>
import jax
import jax.numpy as jnp
from jax.experimental import pallas as pl
from jax.experimental.pallas import tpu as pltpu

_LANE = 128
_MIB = 1024 * 1024

# Cap the row tile so the lane-padded (tr, 1) f32 param blocks
# (tr * 128 * 4 bytes each, double-buffered, x2 params) stay <= 4 MiB of VMEM.
_TR_CAP = 2048

# If the whole (padded) array exceeds this but the grid collapsed to (1, 1),
# split one axis so v7x's 2 TensorCores both get work and the DMA pipeline
# has something to overlap.  No cost on single-TC v5e/v6e.
_MEGACORE_SPLIT_BYTES = 2 * _MIB


def _sublane(dtype) -> int:
    # Native sublane packing: f32 -> 8, bf16/f16 -> 16, int8/fp8 -> 32.
    return {4: 8, 2: 16, 1: 32}.get(jnp.dtype(dtype).itemsize, 8)


def _round_up(x, m):
    return (x + m - 1) // m * m


def _vmem_capacity_bytes() -> int:
    try:
        return int(pltpu.get_tpu_info().vmem_capacity_bytes)
    except Exception:
        return 64 * _MIB  # conservative default: v7x per-TensorCore VMEM


def _kernel(x_ref, scale_ref, shift_ref, o_ref):
    # Memory-bound FMA.  Params stay f32; compute in f32 (free -- HBM
    # bandwidth binds on every generation) and cast only the result.
    x = x_ref[...].astype(jnp.float32)
    o_ref[...] = (x * scale_ref[...] + shift_ref[...]).astype(o_ref.dtype)


def _pick_tiles(rows, cols_pad, itemsize, sub, tile_bytes):
    """cols_pad is a multiple of 128.  Returns lane/sublane-aligned (tr, tc)."""
    # Prefer the full (padded) row width: one contiguous HBM DMA per buffer
    # and unmasked lane-dense stores; otherwise a large multiple of 128.
    max_tc = max(_LANE, (tile_bytes // (sub * itemsize)) // _LANE * _LANE)
    tc = cols_pad if cols_pad <= max_tc else max_tc
    # Grow rows to fill the budget; cap so param lane padding stays bounded.
    tr = max(sub, (tile_bytes // (tc * itemsize)) // sub * sub)
    tr = min(tr, _TR_CAP)
    if rows <= tr:
        tr = rows  # full-dim block is always legal
    # Ensure a big array yields >= 2 blocks (v7x megacore + pipelining).
    if (pl.cdiv(rows, tr) * pl.cdiv(cols_pad, tc) == 1
            and rows * cols_pad * itemsize > _MEGACORE_SPLIT_BYTES):
        if rows >= 2 * sub:
            tr = _round_up(pl.cdiv(rows, 2), sub)
        elif cols_pad >= 2 * _LANE:
            tc = _round_up(pl.cdiv(cols_pad, 2), _LANE)
    return tr, tc


@jax.jit
def inverse_scaling(x, scale, shift):
    """x: (B, C, H, W); scale/shift broadcastable to (C,) (e.g. (C,) or (C,1,1)).

    Returns x * scale[c] + shift[c]  (PyTorch InverseScaling.forward).
    """
    B, C, H, W = x.shape
    rows, cols = B * C, H * W

    out_dtype = jnp.result_type(x.dtype, scale.dtype, shift.dtype)
    x_it = jnp.dtype(x.dtype).itemsize
    o_it = jnp.dtype(out_dtype).itemsize
    itemsize = max(x_it, o_it)
    sub = max(_sublane(x.dtype), _sublane(out_dtype))

    # Generation-aware block budget: v5e/v6e have 128 MiB physical VMEM,
    # v7x only 64 MiB per TensorCore.
    vmem_cap = _vmem_capacity_bytes()
    tile_bytes = 8 * _MIB if vmem_cap >= 96 * _MIB else 4 * _MIB

    # Lane-dense padding: pad the flattened width to a multiple of 128 so all
    # stores are full unmasked vst (largest documented lever for store-bound
    # elementwise kernels).  Padded columns compute garbage and are sliced off.
    cols_pad = _round_up(cols, _LANE)
    x2d = x.reshape(rows, cols)
    if cols_pad != cols:
        x2d = jnp.pad(x2d, ((0, 0), (0, cols_pad - cols)))

    tr, tc = _pick_tiles(rows, cols_pad, itemsize, sub, tile_bytes)
    grid_r, grid_c = pl.cdiv(rows, tr), pl.cdiv(cols_pad, tc)

    # Per-row params (row b*C + c -> channel c), kept in f32 for precision.
    # TODO(synk): if scale/shift are frozen parameters, precompute these two
    # (rows, 1) arrays once outside the per-call path.
    scale_c = jnp.broadcast_to(jnp.ravel(scale).astype(jnp.float32), (C,))
    shift_c = jnp.broadcast_to(jnp.ravel(shift).astype(jnp.float32), (C,))
    scale_rows = jnp.tile(scale_c, (B,)).reshape(rows, 1)
    shift_rows = jnp.tile(shift_c, (B,)).reshape(rows, 1)

    # (tr, 1) param block re-DMAs only when the row index changes (cols vary
    # fastest in the grid); the ~KB transfer hides under the multi-MiB x/out DMAs.
    param_spec = pl.BlockSpec((tr, 1), lambda i, j: (i, 0))

    # VMEM plan: double-buffered x + out blocks plus the lane-padded
    # (tr, 1) -> (tr, 128) f32 param blocks; leave compiler headroom.
    plan = 2 * tr * tc * (x_it + o_it) + 2 * 2 * tr * _LANE * 4
    vmem_limit = min(max(plan + 8 * _MIB, 32 * _MIB),
                     max(vmem_cap - 16 * _MIB, plan + 2 * _MIB))

    out2d = pl.pallas_call(
        _kernel,
        out_shape=jax.ShapeDtypeStruct((rows, cols_pad), out_dtype),
        grid_spec=pltpu.PrefetchScalarGridSpec(
            num_scalar_prefetch=0,
            grid=(grid_r, grid_c),
            in_specs=[
                pl.BlockSpec((tr, tc), lambda i, j: (i, j)),
                param_spec,
                param_spec,
            ],
            out_specs=pl.BlockSpec((tr, tc), lambda i, j: (i, j)),
        ),
        compiler_params=pltpu.CompilerParams(
            # Both axes independent -> shards across v7x's 2 TensorCores;
            # no-op on single-TC v5e/v6e.
            dimension_semantics=("parallel", "parallel"),
            vmem_limit_bytes=int(vmem_limit),
        ),
    )(x2d, scale_rows, shift_rows)

    if cols_pad != cols:
        out2d = out2d[:, :cols]
    return out2d.reshape(B, C, H, W)


if __name__ == "__main__":
    key = jax.random.PRNGKey(0)
    kx, ks, kb = jax.random.split(key, 3)

    B, C, H, W = 2, 4, 16, 16
    x = jax.random.normal(kx, (B, C, H, W), dtype=jnp.float32)
    # Deterministic "parameters" (same role as the frozen nn.Parameters).
    scale = jax.random.uniform(ks, (C,), dtype=jnp.float32, minval=0.5, maxval=2.0)
    shift = jax.random.normal(kb, (C,), dtype=jnp.float32)

    out = inverse_scaling(x, scale, shift)
    out = jax.block_until_ready(out)

    # Reference check (pure JAX, mirrors PyTorch broadcasting of (C,1,1) params).
    ref = x * scale.reshape(1, C, 1, 1) + shift.reshape(1, C, 1, 1)
    assert out.shape == ref.shape and out.dtype == ref.dtype
    assert jnp.allclose(out, ref, atol=1e-6, rtol=1e-6)

    print("KERNEL_OK")
</pallas_src>

<mosaic_0001>
module attributes {stable_mosaic.version = 11 : i64} {
  func.func @_kernel(%arg0: i32, %arg1: i32, %arg2: memref<8x256xf32, #tpu.memory_space<vmem>>, %arg3: memref<8x1xf32, #tpu.memory_space<vmem>>, %arg4: memref<8x1xf32, #tpu.memory_space<vmem>>, %arg5: memref<8x256xf32, #tpu.memory_space<vmem>>) attributes {dimension_semantics = [#tpu.dimension_semantics<parallel>, #tpu.dimension_semantics<parallel>], iteration_bounds = array<i64: 1, 1>, scalar_prefetch = 0 : i64, scratch_operands = 0 : i64, tpu.core_type = #tpu.core_type<tc>, window_params = [{transform_indices = @transform_0, window_bounds = array<i64: 8, 256>}, {transform_indices = @transform_1, window_bounds = array<i64: 8, 1>}, {transform_indices = @transform_2, window_bounds = array<i64: 8, 1>}, {transform_indices = @transform_3, window_bounds = array<i64: 8, 256>}]} {
    %c0 = arith.constant 0 : index
    %c0_0 = arith.constant 0 : index
    %0 = vector.load %arg2[%c0, %c0_0] : memref<8x256xf32, #tpu.memory_space<vmem>>, vector<8x256xf32>
    %c0_1 = arith.constant 0 : index
    %c0_2 = arith.constant 0 : index
    %1 = vector.load %arg3[%c0_1, %c0_2] : memref<8x1xf32, #tpu.memory_space<vmem>>, vector<8x1xf32>
    %2 = vector.broadcast %1 : vector<8x1xf32> to vector<8x256xf32>
    %3 = arith.mulf %0, %2 : vector<8x256xf32>
    %c0_3 = arith.constant 0 : index
    %c0_4 = arith.constant 0 : index
    %4 = vector.load %arg4[%c0_3, %c0_4] : memref<8x1xf32, #tpu.memory_space<vmem>>, vector<8x1xf32>
    %5 = vector.broadcast %4 : vector<8x1xf32> to vector<8x256xf32>
    %6 = arith.addf %3, %5 : vector<8x256xf32>
    %c0_5 = arith.constant 0 : index
    %c0_6 = arith.constant 0 : index
    %7 = vector.load %arg5[%c0_5, %c0_6] : memref<8x256xf32, #tpu.memory_space<vmem>>, vector<8x256xf32>
    tpu.vector_store %arg5[%c0_5, %c0_6], %6 {strides = array<i32>} : memref<8x256xf32, #tpu.memory_space<vmem>>, vector<8x256xf32>,
    return
  }
  func.func @transform_0(%arg0: i32, %arg1: i32) -> (i32, i32) {
    %c0_i32 = arith.constant 0 : i32
    return %arg0, %arg1 : i32, i32
  }
  func.func @transform_1(%arg0: i32, %arg1: i32) -> (i32, i32) {
    %c0_i32 = arith.constant 0 : i32
    %c0_i32_0 = arith.constant 0 : i32
    return %arg0, %c0_i32 : i32, i32
  }
  func.func @transform_2(%arg0: i32, %arg1: i32) -> (i32, i32) {
    %c0_i32 = arith.constant 0 : i32
    %c0_i32_0 = arith.constant 0 : i32
    return %arg0, %c0_i32 : i32, i32
  }
  func.func @transform_3(%arg0: i32, %arg1: i32) -> (i32, i32) {
    %c0_i32 = arith.constant 0 : i32
    return %arg0, %arg1 : i32, i32
  }
}

</mosaic_0001>

<bundles_post_ra>
// kernel: tile.1
= control target key start
LH: loop header
LB: loop body
LE: loop exit
PB: predicated region body
PF: predicated region fallthrough
CT: control target
= control target key end

     0   :  { %s34_s8 = smov 125   ;;  %s35_s9 = smov 126   ;;  %vm7_vm0 = vcmask 7168   ;;  %s61_s0 = inlined_call_operand.vmem [shape: f32[2,4], index: 0, kind: input, shape index: {}]   ;;  %s62_s1 = inlined_call_operand.vmem [shape: f32[8,1], index: 1, kind: output, shape index: {}]  }
   0x1   :  { %v4_v0 = vld [vmem:[%s61_s0] sm:$0x3]  ;;  %s33_s0 = smov 127  }
   0x2   :  { %5 = vst [vmem:[#allocation0] sm:$0x3] %v4_v0 }
   0x9   :  { %v9_v1 = vld [vmem:[#allocation0] sm:$0x3]  }
   0xa   :  { %v21_v2 = vld [vmem:[#allocation0] sm:$0x3]   ;;  %10 = vrot.lane.b32.xlu0 %v9_v1, %s33_s0 }
   0xb   :  { %22 = vrot.lane.b32.xlu1 %v21_v2, %s34_s8  ;;  %v15_v3 = vld [vmem:[#allocation0] sm:$0x3]  }
   0xc   :  { %v6_v4 = vld [vmem:[#allocation0] sm:$0x3]  }
   0xd   :  { %8 = vst.msk [vmem:[%s62_s1] ss:$4 sm:$0x3] %vm7_vm0, %v6_v4  }
  0x12   :  { %16 = vrot.lane.b32.xlu0 %v15_v3, %s35_s9 }
  0x7c   :  { %v11_v5 = vpop.permute.xlu0 %10  }
  0x7d   :  { %v23_v6 = vpop.permute.xlu1 %22   ;;  %27 = vst.msk [vmem:[%s62_s1 + $0x1] ss:$4 sm:$0x3] %vm7_vm0, %v11_v5  }
  0x7e   :  { %29 = vst.msk [vmem:[%s62_s1 + $0x3] ss:$4 sm:$0x3] %vm7_vm0, %v23_v6  }
  0x84   :  { %v17_v7 = vpop.permute.xlu0 %16  }
  0x85   :  { %28 = vst.msk [vmem:[%s62_s1 + $0x2] ss:$4 sm:$0x3] %vm7_vm0, %v17_v7  }

// kernel: tile.18
= control target key start
LH: loop header
LB: loop body
LE: loop exit
PB: predicated region body
PF: predicated region fallthrough
CT: control target
= control target key end

     0   :  { %s22_s0 = inlined_call_operand.vmem [shape: f32[4], index: 0, kind: input, shape index: {}]   ;;  %s23_s1 = inlined_call_operand.vmem [shape: f32[2,4], index: 1, kind: output, shape index: {}]  }
   0x1   :  { %v4_v0 = vld [vmem:[%s22_s0] ss:$0 sm:$0xff] }
   0x2   :  { %5 = vst [vmem:[%s23_s1] sm:$0x3] %v4_v0 }

// kernel: tile.13
= control target key start
LH: loop header
LB: loop body
LE: loop exit
PB: predicated region body
PF: predicated region fallthrough
CT: control target
= control target key end

     0   :  { %2 = vsyncpa [#allocation1], 0  ;;  %s48_s8 = smov [#allocation0]   ;;  %s65_s0 = inlined_call_operand.hbm [shape: f32[4], index: 0, kind: input, shape index: {}]   ;;  %s66_s1 = inlined_call_operand.vmem [shape: f32[2,4], index: 1, kind: output, shape index: {}]  }
   0x1   :  { %s8_s0 = sshll.u32 %s65_s0, 4  ;;  %s10_s9 = sshll.u32 %s48_s8, 4  ;;  %s9_s0 = int_to_ptr.hbm [resolvable:$true] %s8_s0  ;;  %s11_s9 = int_to_ptr.vmem [resolvable:$true] %s10_s9 }
   0x2   :  { %13 = dma.hbm_to_vmem [thread:$0]  %s9_s0, 16, %s11_s9, [#allocation1]  }
   0x3   :  { %46 = dma.done.wait [#allocation1], 16  }
   0x4   :  { %47 = vsyncadd [#allocation1], 4294967280  ;;  %v18_v0 = vld [vmem:[#allocation0] ss:$0 sm:$0xff] }
   0x5   :  { %19 = vst [vmem:[%s66_s1] sm:$0x3] %v18_v0 }
   0x6   :  { %20 = vsyncpa [#allocation1], 1 }

// kernel: inverse_scaling.1
= control target key start
LH: loop header
LB: loop body
LE: loop exit
PB: predicated region body
PF: predicated region fallthrough
CT: control target
= control target key end

     0   :  { %v40_v0 = vmov 0   ;;  %s79_s1 = inlined_call_operand.vmem [shape: f32[8,1], index: 1, kind: input, shape index: {}]   ;;  %s80_s2 = inlined_call_operand.vmem [shape: f32[8,1], index: 2, kind: input, shape index: {}]   ;;  %s81_s0 = inlined_call_operand.vmem [shape: f32[8,256], index: 0, kind: input, shape index: {}]   ;;  %s82_s3 = inlined_call_operand.vmem [shape: f32[8,256], index: 3, kind: output, shape index: {}]  }
   0x1   :  { %39 = vset.pattern.permute.xlu0 %v40_v0  ;;  %v16_v1 = vld [vmem:[%s79_s1] sm:$0xff]  ;;  %v15_v5 = vld [vmem:[%s81_s0 + $0x8] sm:$0xff] }
   0x2   :  { %19 = vperm.xlu0 %39, %v16_v1   ;;  %v24_v2 = vld [vmem:[%s80_s2] sm:$0xff] }
   0x3   :  { %v14_v4 = vld [vmem:[%s81_s0] sm:$0xff] }
   0xa   :  { %27 = vperm.xlu0 %39, %v24_v2  }
  0x74   :  { %v20_v3 = vpop.permute.xlu0 %19 }
  0x75   :  { %v22_v6 = vmul.f32 %v20_v3, %v14_v4  ;;  %v23_v7 = vmul.f32 %v20_v3, %v15_v5 }
  0x7c   :  { %v28_v8 = vpop.permute.xlu0 %27 }
  0x7d   :  { %v30_v9 = vadd.f32 %v28_v8, %v22_v6  ;;  %v31_v10 = vadd.f32 %v28_v8, %v23_v7 }
  0x7f   :  { %32 = vst [vmem:[%s82_s3] sm:$0xff] %v30_v9 }
  0x80   :  { %33 = vst [vmem:[%s82_s3 + $0x8] sm:$0xff] %v31_v10 }

</bundles_post_ra>
